<compile_context>
chip_gen: v5e
topology: v5e:2x2
jax: 0.10.0
libtpu: 0.0.40
codegen_flags: <defaults>
</compile_context>

<pallas_src>
import functools

import jax
import jax.numpy as jnp
from jax.experimental import pallas as pl
from jax.experimental.pallas import tpu as pltpu


def actor_forward_kernel(x_ref, w1_ref, b1_ref, w2_ref, b2_ref, w3_ref, b3_ref,
                         act_ref, logp_ref):
    # x_ref: [F, TB] (matmul dtype, batch on lanes); weights [out, in]; biases [out, 1] f32.
    x = x_ref[...]

    # NN forward: Linear -> tanh -> Linear -> tanh -> Linear, bf16 MXU operands, f32 accum.
    h = jnp.dot(w1_ref[...], x, preferred_element_type=jnp.float32) + b1_ref[...]
    h = jnp.tanh(h)                                                    # f32 tanh (v5e-safe)
    h = jnp.dot(w2_ref[...], h.astype(w2_ref.dtype),
                preferred_element_type=jnp.float32) + b2_ref[...]
    h = jnp.tanh(h)
    logits = jnp.dot(w3_ref[...], h.astype(w3_ref.dtype),
                     preferred_element_type=jnp.float32) + b3_ref[...]  # [A, TB]

    # Stable softmax statistics over the action axis (sublanes).
    m = jnp.max(logits, axis=0, keepdims=True)                          # [1, TB]
    denom = jnp.sum(jnp.exp(logits - m), axis=0, keepdims=True)         # [1, TB]

    # argmax over actions (first occurrence); softmax is monotone so
    # argmax(probs) == argmax(logits).
    num_actions = logits.shape[0]
    row = jax.lax.broadcasted_iota(jnp.int32, logits.shape, 0)
    actions = jnp.min(jnp.where(logits == m, row, num_actions),
                      axis=0, keepdims=True)                            # [1, TB]

    # log_softmax(logits)[argmax] == (logits[argmax] - m) - log(denom) == -log(denom).
    logp = -jnp.log(denom)                                              # [1, TB]

    act_ref[...] = actions.astype(jnp.int32)
    logp_ref[...] = logp.astype(jnp.float32)


def _round_up(x, m):
    return ((x + m - 1) // m) * m


@functools.partial(jax.jit, static_argnames=("tb", "matmul_dtype"))
def actor_critic_forward(features, w1, b1, w2, b2, w3, b3, *,
                         tb=1024, matmul_dtype=jnp.bfloat16):
    """Deterministic ActorCritic.forward.

    Args:  features [B, F];  weights in PyTorch layout (w_i: [out, in], b_i: [out]).
    Returns: (actions [B, 1] int32, log_probs [B, 1] float32).
    """
    B, F = features.shape

    # Lane-aligned batch tile: batch sits on the 128-lane axis inside the kernel.
    TB = min(tb, _round_up(B, 128))
    Bp = _round_up(B, TB)

    # Transposed + padded feature slab [F, Bp]; bf16 MXU operands, f32 biases.
    xT = jnp.transpose(features).astype(matmul_dtype)
    if Bp != B:
        xT = jnp.pad(xT, ((0, 0), (0, Bp - B)))

    w1c = w1.astype(matmul_dtype)
    w2c = w2.astype(matmul_dtype)
    w3c = w3.astype(matmul_dtype)
    b1c = b1.reshape(-1, 1).astype(jnp.float32)
    b2c = b2.reshape(-1, 1).astype(jnp.float32)
    b3c = b3.reshape(-1, 1).astype(jnp.float32)

    def _const(shape):
        n = len(shape)
        return pl.BlockSpec(shape, lambda i, _n=n: (0,) * _n)  # VMEM-resident across grid

    grid = (Bp // TB,)
    actions, log_probs = pl.pallas_call(
        actor_forward_kernel,
        out_shape=(jax.ShapeDtypeStruct((1, Bp), jnp.int32),
                   jax.ShapeDtypeStruct((1, Bp), jnp.float32)),
        grid=grid,
        in_specs=(
            pl.BlockSpec((F, TB), lambda i: (0, i)),   # streamed feature tiles
            _const(w1c.shape), _const(b1c.shape),
            _const(w2c.shape), _const(b2c.shape),
            _const(w3c.shape), _const(b3c.shape),
        ),
        out_specs=(
            pl.BlockSpec((1, TB), lambda i: (0, i)),   # lane-dense outputs
            pl.BlockSpec((1, TB), lambda i: (0, i)),
        ),
        compiler_params=pltpu.CompilerParams(
            dimension_semantics=("parallel",)),        # batch tiles across v7x cores
    )(xT, w1c, b1c, w2c, b2c, w3c, b3c)

    return (actions[0, :B].reshape(B, 1),
            log_probs[0, :B].reshape(B, 1))


def _init_linear(key, fan_in, fan_out):
    # PyTorch nn.Linear default init, PyTorch layout: w [out, in], b [out].
    kw, kb = jax.random.split(key)
    bound = 1.0 / jnp.sqrt(jnp.float32(fan_in))
    w = jax.random.uniform(kw, (fan_out, fan_in), jnp.float32, -bound, bound)
    b = jax.random.uniform(kb, (fan_out,), jnp.float32, -bound, bound)
    return w, b


def _reference(features, w1, b1, w2, b2, w3, b3, matmul_dtype=jnp.bfloat16):
    d = matmul_dtype
    x = features.astype(d)
    h = jnp.tanh(jnp.dot(x, w1.T.astype(d), preferred_element_type=jnp.float32) + b1[None, :])
    h = jnp.tanh(jnp.dot(h.astype(d), w2.T.astype(d), preferred_element_type=jnp.float32) + b2[None, :])
    logits = jnp.dot(h.astype(d), w3.T.astype(d), preferred_element_type=jnp.float32) + b3[None, :]
    logp_all = jax.nn.log_softmax(logits, axis=1)
    actions = jnp.argmax(logits, axis=1)
    logp = jnp.take_along_axis(logp_all, actions[:, None], axis=1)
    return actions[:, None].astype(jnp.int32), logp


if __name__ == "__main__":
    # CartPole-like shapes: featExtractor.outSize=4, action_space=2, hidden=[64, 64]
    B, IN_DIM, H1, H2, A = 8, 4, 64, 64, 2

    key = jax.random.PRNGKey(0)
    kx, k1, k2, k3 = jax.random.split(key, 4)
    features = jax.random.normal(kx, (B, IN_DIM), jnp.float32)
    w1, b1 = _init_linear(k1, IN_DIM, H1)
    w2, b2 = _init_linear(k2, H1, H2)
    w3, b3 = _init_linear(k3, H2, A)

    actions, log_probs = actor_critic_forward(features, w1, b1, w2, b2, w3, b3)
    jax.block_until_ready((actions, log_probs))

    ref_actions, ref_logp = _reference(features, w1, b1, w2, b2, w3, b3)
    assert jnp.array_equal(actions, ref_actions), (actions, ref_actions)
    assert jnp.allclose(log_probs, ref_logp, atol=1e-4, rtol=1e-4), (log_probs, ref_logp)

    # TODO(synk): Categorical.sample() (random=True branch), the critic value head
    # (evaluate) and the training-side optimizers/buffers have no kernel-side
    # equivalent; only the deterministic forward (argmax + log_prob) is implemented.
    print("KERNEL_OK")
</pallas_src>

<mosaic_0001>
module attributes {stable_mosaic.version = 11 : i64} {
  func.func @actor_forward_kernel(%arg0: i32, %arg1: memref<4x128xbf16, #tpu.memory_space<vmem>>, %arg2: memref<64x4xbf16, #tpu.memory_space<vmem>>, %arg3: memref<64x1xf32, #tpu.memory_space<vmem>>, %arg4: memref<64x64xbf16, #tpu.memory_space<vmem>>, %arg5: memref<64x1xf32, #tpu.memory_space<vmem>>, %arg6: memref<2x64xbf16, #tpu.memory_space<vmem>>, %arg7: memref<2x1xf32, #tpu.memory_space<vmem>>, %arg8: memref<1x128xi32, #tpu.memory_space<vmem>>, %arg9: memref<1x128xf32, #tpu.memory_space<vmem>>) attributes {dimension_semantics = [#tpu.dimension_semantics<parallel>], iteration_bounds = array<i64: 1>, scalar_prefetch = 0 : i64, scratch_operands = 0 : i64, tpu.core_type = #tpu.core_type<tc>, window_params = [{transform_indices = @transform_0, window_bounds = array<i64: 4, 128>}, {pipeline_mode = #tpu.pipeline_mode<synchronous>, transform_indices = @transform_1, window_bounds = array<i64: 64, 4>}, {pipeline_mode = #tpu.pipeline_mode<synchronous>, transform_indices = @transform_2, window_bounds = array<i64: 64, 1>}, {pipeline_mode = #tpu.pipeline_mode<synchronous>, transform_indices = @transform_3, window_bounds = array<i64: 64, 64>}, {pipeline_mode = #tpu.pipeline_mode<synchronous>, transform_indices = @transform_4, window_bounds = array<i64: 64, 1>}, {pipeline_mode = #tpu.pipeline_mode<synchronous>, transform_indices = @transform_5, window_bounds = array<i64: 2, 64>}, {pipeline_mode = #tpu.pipeline_mode<synchronous>, transform_indices = @transform_6, window_bounds = array<i64: 2, 1>}, {transform_indices = @transform_7, window_bounds = array<i64: 1, 128>}, {transform_indices = @transform_8, window_bounds = array<i64: 1, 128>}]} {
    %c0 = arith.constant 0 : index
    %c0_0 = arith.constant 0 : index
    %0 = vector.load %arg1[%c0, %c0_0] : memref<4x128xbf16, #tpu.memory_space<vmem>>, vector<4x128xbf16>
    %c0_1 = arith.constant 0 : index
    %c0_2 = arith.constant 0 : index
    %1 = vector.load %arg2[%c0_1, %c0_2] : memref<64x4xbf16, #tpu.memory_space<vmem>>, vector<64x4xbf16>
    %cst = arith.constant dense<0.000000e+00> : vector<64x128xf32>
    %2 = tpu.matmul %1, %0, %cst {dimension_numbers = #tpu.dot_dimension_numbers<[1], [0], [0], [1], [0, 0, 1, 1], [], []>} : vector<64x4xbf16>, vector<4x128xbf16>, vector<64x128xf32> -> vector<64x128xf32>
    %c0_3 = arith.constant 0 : index
    %c0_4 = arith.constant 0 : index
    %3 = vector.load %arg3[%c0_3, %c0_4] : memref<64x1xf32, #tpu.memory_space<vmem>>, vector<64x1xf32>
    %4 = vector.broadcast %3 : vector<64x1xf32> to vector<64x128xf32>
    %5 = arith.addf %2, %4 : vector<64x128xf32>
    %6 = math.tanh %5 : vector<64x128xf32>
    %c0_5 = arith.constant 0 : index
    %c0_6 = arith.constant 0 : index
    %7 = vector.load %arg4[%c0_5, %c0_6] : memref<64x64xbf16, #tpu.memory_space<vmem>>, vector<64x64xbf16>
    %8 = arith.truncf %6 : vector<64x128xf32> to vector<64x128xbf16>
    %cst_7 = arith.constant dense<0.000000e+00> : vector<64x128xf32>
    %9 = tpu.matmul %7, %8, %cst_7 {dimension_numbers = #tpu.dot_dimension_numbers<[1], [0], [0], [1], [0, 0, 1, 1], [], []>} : vector<64x64xbf16>, vector<64x128xbf16>, vector<64x128xf32> -> vector<64x128xf32>
    %c0_8 = arith.constant 0 : index
    %c0_9 = arith.constant 0 : index
    %10 = vector.load %arg5[%c0_8, %c0_9] : memref<64x1xf32, #tpu.memory_space<vmem>>, vector<64x1xf32>
    %11 = vector.broadcast %10 : vector<64x1xf32> to vector<64x128xf32>
    %12 = arith.addf %9, %11 : vector<64x128xf32>
    %13 = math.tanh %12 : vector<64x128xf32>
    %c0_10 = arith.constant 0 : index
    %c0_11 = arith.constant 0 : index
    %14 = vector.load %arg6[%c0_10, %c0_11] : memref<2x64xbf16, #tpu.memory_space<vmem>>, vector<2x64xbf16>
    %15 = arith.truncf %13 : vector<64x128xf32> to vector<64x128xbf16>
    %cst_12 = arith.constant dense<0.000000e+00> : vector<2x128xf32>
    %16 = tpu.matmul %14, %15, %cst_12 {dimension_numbers = #tpu.dot_dimension_numbers<[1], [0], [0], [1], [0, 0, 1, 1], [], []>} : vector<2x64xbf16>, vector<64x128xbf16>, vector<2x128xf32> -> vector<2x128xf32>
    %c0_13 = arith.constant 0 : index
    %c0_14 = arith.constant 0 : index
    %17 = vector.load %arg7[%c0_13, %c0_14] : memref<2x1xf32, #tpu.memory_space<vmem>>, vector<2x1xf32>
    %18 = vector.broadcast %17 : vector<2x1xf32> to vector<2x128xf32>
    %19 = arith.addf %16, %18 : vector<2x128xf32>
    %cst_15 = arith.constant dense<0xFF800000> : vector<128xf32>
    %20 = vector.multi_reduction <maximumf>, %19, %cst_15 [0] : vector<2x128xf32> to vector<128xf32>
    %21 = vector.shape_cast %20 : vector<128xf32> to vector<1x128xf32>
    %22 = vector.broadcast %21 : vector<1x128xf32> to vector<2x128xf32>
    %23 = arith.subf %19, %22 : vector<2x128xf32>
    %24 = math.exp %23 : vector<2x128xf32>
    %cst_16 = arith.constant dense<0.000000e+00> : vector<128xf32>
    %25 = vector.multi_reduction <add>, %24, %cst_16 [0] : vector<2x128xf32> to vector<128xf32>
    %26 = vector.shape_cast %25 : vector<128xf32> to vector<1x128xf32>
    %27 = tpu.iota {dimensions = array<i32: 0>} : vector<2x128xi32>
    %28 = vector.broadcast %21 : vector<1x128xf32> to vector<2x128xf32>
    %29 = arith.cmpf oeq, %19, %28 : vector<2x128xf32>
    %c2_i32 = arith.constant 2 : i32
    %30 = vector.broadcast %c2_i32 : i32 to vector<2x128xi32>
    %31 = arith.select %29, %27, %30 : vector<2x128xi1>, vector<2x128xi32>
    %cst_17 = arith.constant dense<2147483647> : vector<128xi32>
    %32 = vector.multi_reduction <minsi>, %31, %cst_17 [0] : vector<2x128xi32> to vector<128xi32>
    %33 = vector.shape_cast %32 : vector<128xi32> to vector<1x128xi32>
    %34 = math.log %26 : vector<1x128xf32>
    %cst_18 = arith.constant 0.000000e+00 : f32
    %35 = vector.broadcast %cst_18 : f32 to vector<1x128xf32>
    %36 = arith.subf %35, %34 : vector<1x128xf32>
    %c0_19 = arith.constant 0 : index
    %c0_20 = arith.constant 0 : index
    %37 = vector.load %arg8[%c0_19, %c0_20] : memref<1x128xi32, #tpu.memory_space<vmem>>, vector<1x128xi32>
    tpu.vector_store %arg8[%c0_19, %c0_20], %33 {strides = array<i32>} : memref<1x128xi32, #tpu.memory_space<vmem>>, vector<1x128xi32>,
    %c0_21 = arith.constant 0 : index
    %c0_22 = arith.constant 0 : index
    %38 = vector.load %arg9[%c0_21, %c0_22] : memref<1x128xf32, #tpu.memory_space<vmem>>, vector<1x128xf32>
    tpu.vector_store %arg9[%c0_21, %c0_22], %36 {strides = array<i32>} : memref<1x128xf32, #tpu.memory_space<vmem>>, vector<1x128xf32>,
    return
  }
  func.func @transform_0(%arg0: i32) -> (i32, i32) {
    %c0_i32 = arith.constant 0 : i32
    %c0_i32_0 = arith.constant 0 : i32
    return %c0_i32, %arg0 : i32, i32
  }
  func.func @transform_1(%arg0: i32) -> (i32, i32) {
    %c0_i32 = arith.constant 0 : i32
    %c0_i32_0 = arith.constant 0 : i32
    %c0_i32_1 = arith.constant 0 : i32
    return %c0_i32, %c0_i32_0 : i32, i32
  }
  func.func @transform_2(%arg0: i32) -> (i32, i32) {
    %c0_i32 = arith.constant 0 : i32
    %c0_i32_0 = arith.constant 0 : i32
    %c0_i32_1 = arith.constant 0 : i32
    return %c0_i32, %c0_i32_0 : i32, i32
  }
  func.func @transform_3(%arg0: i32) -> (i32, i32) {
    %c0_i32 = arith.constant 0 : i32
    %c0_i32_0 = arith.constant 0 : i32
    %c0_i32_1 = arith.constant 0 : i32
    return %c0_i32, %c0_i32_0 : i32, i32
  }
  func.func @transform_4(%arg0: i32) -> (i32, i32) {
    %c0_i32 = arith.constant 0 : i32
    %c0_i32_0 = arith.constant 0 : i32
    %c0_i32_1 = arith.constant 0 : i32
    return %c0_i32, %c0_i32_0 : i32, i32
  }
  func.func @transform_5(%arg0: i32) -> (i32, i32) {
    %c0_i32 = arith.constant 0 : i32
    %c0_i32_0 = arith.constant 0 : i32
    %c0_i32_1 = arith.constant 0 : i32
    return %c0_i32, %c0_i32_0 : i32, i32
  }
  func.func @transform_6(%arg0: i32) -> (i32, i32) {
    %c0_i32 = arith.constant 0 : i32
    %c0_i32_0 = arith.constant 0 : i32
    %c0_i32_1 = arith.constant 0 : i32
    return %c0_i32, %c0_i32_0 : i32, i32
  }
  func.func @transform_7(%arg0: i32) -> (i32, i32) {
    %c0_i32 = arith.constant 0 : i32
    %c0_i32_0 = arith.constant 0 : i32
    return %c0_i32, %arg0 : i32, i32
  }
  func.func @transform_8(%arg0: i32) -> (i32, i32) {
    %c0_i32 = arith.constant 0 : i32
    %c0_i32_0 = arith.constant 0 : i32
    return %c0_i32, %arg0 : i32, i32
  }
}

</mosaic_0001>

<bundles_post_ra>
// kernel: actor_critic_forward.1
= control target key start
LH: loop header
LB: loop body
LE: loop exit
PB: predicated region body
PF: predicated region fallthrough
CT: control target
= control target key end

     0   :  { %vm119_vm0 = vcmask 1041408   ;;  %v459_v0 = vmov 0   ;;  %vm106_vm1 = vcmask 31744   ;;  %vm240_vm2 = vcmask 523264   ;;  %s605_s2 = inlined_call_operand.vmem [shape: f32[64,1], index: 2, kind: input, shape index: {}]   ;;  %s606_s0 = inlined_call_operand.vmem [shape: bf16[4,128], index: 0, kind: input, shape index: {}]   ;;  %s607_s1 = inlined_call_operand.vmem [shape: bf16[64,4], index: 1, kind: input, shape index: {}]   ;;  %s608_s4 = inlined_call_operand.vmem [shape: f32[64,1], index: 4, kind: input, shape index: {}]   ;;  %s609_s6 = inlined_call_operand.vmem [shape: f32[2,1], index: 6, kind: input, shape index: {}]   ;;  %s610_s3 = inlined_call_operand.vmem [shape: bf16[64,64], index: 3, kind: input, shape index: {}]   ;;  %s611_s5 = inlined_call_operand.vmem [shape: bf16[2,64], index: 5, kind: input, shape index: {}]   ;;  %s612_s7 = inlined_call_operand.vmem [shape: s32[1,128], index: 7, kind: output, shape index: {0}]   ;;  %s613_s8 = inlined_call_operand.vmem [shape: f32[1,128], index: 8, kind: output, shape index: {1}]  }
   0x1   :  { %420 = vset.pattern.permute.xlu0 %v459_v0  ;;  %v44_v1 = vld [vmem:[%s605_s2 + $0x30] sm:$0xff]  ;;  %v29_v2 = vld [vmem:[%s606_s0] sm:$0x3]  ;;  %421 = vset.pattern.permute.xlu1 %v459_v0  ;;  %v405_v6 = vld [vmem:[%s607_s1 + $0x18] sm:$0xff] }
   0x2   :  { %78 = vperm.xlu0 %420, %v44_v1   ;;  %v121_v3 = vsel %vm119_vm0, %v29_v2, 0  ;;  %v402_v4 = vld [vmem:[%s607_s1] sm:$0xff]  ;;  %422 = vset.pattern.permute.xlu2 %v459_v0  ;;  %v40_v7 = vld [vmem:[%s605_s2 + $0x10] sm:$0xff]  ;;  %v45_v8 = vld [vmem:[%s605_s2 + $0x38] sm:$0xff] }
   0x3   :  { %v42_v5 = vld [vmem:[%s605_s2 + $0x20] sm:$0xff]  ;;  %130 = vmatpush.bf16.msra.mxu0 %v121_v3  ;;  %410 = vmatpush.bf16.msra.mxu1 %v121_v3  ;;  %v43_v9 = vld [vmem:[%s605_s2 + $0x28] sm:$0xff]  ;;  %v41_v10 = vld [vmem:[%s605_s2 + $0x18] sm:$0xff] }
   0x4   :  { %68 = vperm.xlu1 %421, %v42_v5   ;;  %58 = vperm.xlu2 %422, %v40_v7   ;;  %v38_v11 = vld [vmem:[%s605_s2] sm:$0xff]  ;;  %v39_v12 = vld [vmem:[%s605_s2 + $0x8] sm:$0xff]  ;;  %v178_v14 = vld [vmem:[%s608_s4 + $0x30] sm:$0xff] }
   0x5   :  { %v403_v13 = vld [vmem:[%s607_s1 + $0x8] sm:$0xff]  ;;  %v179_v15 = vld [vmem:[%s608_s4 + $0x38] sm:$0xff]  ;;  %v176_v16 = vld [vmem:[%s608_s4 + $0x20] sm:$0xff] }
   0x6   :  { %377 = vmatmul.msk.bf16.vlgmr.msra.gmra.mxu0 %vm106_vm1, %v402_v4  ;;  %380 = vmatmul.msk.bf16.vlgmr.msra.gmra.mxu1 %vm106_vm1, %v405_v6  ;;  %v177_v17 = vld [vmem:[%s608_s4 + $0x28] sm:$0xff]  ;;  %v174_v18 = vld [vmem:[%s608_s4 + $0x10] sm:$0xff]  ;;  %v175_v19 = vld [vmem:[%s608_s4 + $0x18] sm:$0xff] }
   0x7   :  { %v404_v20 = vld [vmem:[%s607_s1 + $0x10] sm:$0xff]  ;;  %v172_v21 = vld [vmem:[%s608_s4] sm:$0xff]  ;;  %v173_v22 = vld [vmem:[%s608_s4 + $0x8] sm:$0xff] }
   0x8   :  { %v295_v23 = vld [vmem:[%s609_s6] sm:$0x3]  ;;  %v407_v61 = vld [vmem:[%s610_s3 + $0x8] sm:$0xff]  ;;  %v408_v62 = vld [vmem:[%s610_s3 + $0x10] sm:$0xff] }
   0x9   :  { %v406_v60 = vld [vmem:[%s610_s3] sm:$0xff]  ;;  %v409_v63 = vld [vmem:[%s610_s3 + $0x18] sm:$0xff] }
   0xa   :  { %83 = vperm.xlu0 %420, %v45_v8  }
   0xc   :  { %73 = vperm.xlu1 %421, %v43_v9   ;;  %63 = vperm.xlu2 %422, %v41_v10  }
  0x12   :  { %48 = vperm.xlu0 %420, %v38_v11  }
  0x14   :  { %53 = vperm.xlu1 %421, %v39_v12   ;;  %212 = vperm.xlu2 %422, %v178_v14  }
  0x16   :  { %378 = vmatmul.msk.bf16.gmra.mxu0 %vm106_vm1, %v403_v13 }
  0x1a   :  { %217 = vperm.xlu0 %420, %v179_v15  }
  0x1c   :  { %202 = vperm.xlu1 %421, %v176_v16   ;;  %207 = vperm.xlu2 %422, %v177_v17  }
  0x22   :  { %192 = vperm.xlu0 %420, %v174_v18  }
  0x24   :  { %197 = vperm.xlu1 %421, %v175_v19   ;;  %182 = vperm.xlu2 %422, %v172_v21  }
  0x26   :  { %379 = vmatmul.msk.bf16.gmra.mxu0 %vm106_vm1, %v404_v20 }
  0x2a   :  { %187 = vperm.xlu0 %420, %v173_v22  }
  0x2c   :  { %298 = vperm.xlu1 %421, %v295_v23  }
  0x5e   :  { %v59_v38 = vpop.permute.xlu2 %58 }
  0x66   :  { %v64_v42 = vpop.permute.xlu2 %63 }
  0x6e   :  { %v213_v3 = vpop.permute.xlu2 %212 }
  0x74   :  { %v79_v24 = vpop.permute.xlu0 %78 }
  0x76   :  { %v69_v36 = vpop.permute.xlu1 %68  ;;  %v208_v10 = vpop.permute.xlu2 %207 }
  0x7c   :  { %v84_v29 = vpop.permute.xlu0 %83 }
  0x7e   :  { %v74_v39 = vpop.permute.xlu1 %73 }
  0x83   :  { %v132_v25 = vpop.f32.mrf.mxu0  ;;  %v147_v26 = vpop.f32.mrf.mxu1 }
  0x84   :  { %v148_v27 = vadd.f32 %v147_v26, %v79_v24  ;;  %v49_v48 = vpop.permute.xlu0 %48  ;;  %v183_v24 = vpop.permute.xlu2 %182 }
  0x85   :  { %v133_v50 = vadd.f32 %v132_v25, %v49_v48 }
  0x86   :  { %423 = vtanh.f32 %v148_v27  ;;  %v54_v46 = vpop.permute.xlu1 %53 }
  0x8b   :  { %v134_v28 = vpop.f32.mrf.mxu0  ;;  %v149_v30 = vpop.f32.mrf.mxu1 }
  0x8c   :  { %v150_v31 = vadd.f32 %v149_v30, %v84_v29  ;;  %v424_v32 = vpop.eup %423  ;;  %v135_v49 = vadd.f32 %v134_v28, %v54_v46  ;;  %v218_v2 = vpop.permute.xlu0 %217 }
  0x8e   :  { %425 = vtanh.f32 %v150_v31  ;;  %v203_v6 = vpop.permute.xlu1 %202 }
  0x93   :  { %v137_v33 = vpop.f32.mrf.mxu0 }
  0x94   :  { %v426_v34 = vpop.eup %425  ;;  %v138_v47 = vadd.f32 %v137_v33, %v59_v38  ;;  %v193_v8 = vpop.permute.xlu0 %192 }
  0x95   :  { %v171_v35 = vpack.c.bf16 %v426_v34, %v424_v32 }
  0x96   :  { %v198_v16 = vpop.permute.xlu1 %197 }
  0x97   :  { %257 = vmatpush.bf16.msrb.mxu1 %v171_v35  ;;  %411 = vmatpush.bf16.msra.mxu2 %v171_v35 }
  0x98   :  { %412 = vmatpush.bf16.msra.mxu3 %v171_v35 }
  0x9b   :  { %v139_v37 = vpop.f32.mrf.mxu0 }
  0x9c   :  { %v140_v44 = vadd.f32 %v139_v37, %v64_v42  ;;  %v188_v21 = vpop.permute.xlu0 %187 }
  0x9e   :  { %v299_v37 = vpop.permute.xlu1 %298 }
  0xa3   :  { %v142_v40 = vpop.f32.mrf.mxu0 }
  0xa4   :  { %v143_v41 = vadd.f32 %v142_v40, %v69_v36  ;;  %v290_v36 = vld [vmem:[%s611_s5] sm:$0x1] }
  0xa6   :  { %427 = vtanh.f32 %v143_v41 }
  0xab   :  { %v144_v43 = vpop.f32.mrf.mxu0 }
  0xac   :  { %v145_v45 = vadd.f32 %v144_v43, %v74_v39  ;;  %v428_v51 = vpop.eup %427 }
  0xae   :  { %429 = vtanh.f32 %v145_v45  ;;  %v334_v45 = vlaneseq }
  0xaf   :  { %431 = vtanh.f32 %v140_v44 }
  0xb0   :  { %433 = vtanh.f32 %v138_v47  ;;  %v335_v48 = vshrl.u32 %v334_v45, 7 }
  0xb1   :  { %435 = vtanh.f32 %v135_v49 }
  0xb2   :  { %437 = vtanh.f32 %v133_v50 }
  0xb4   :  { %v430_v52 = vpop.eup %429 }
  0xb5   :  { %v170_v53 = vpack.c.bf16 %v430_v52, %v428_v51  ;;  %v432_v54 = vpop.eup %431 }
  0xb6   :  { %v434_v55 = vpop.eup %433 }
  0xb7   :  { %258 = vmatpush.bf16.msrb.mxu1 %v170_v53  ;;  %413 = vmatpush.bf16.msra.mxu2 %v170_v53  ;;  %v169_v56 = vpack.c.bf16 %v432_v54, %v434_v55  ;;  %v436_v57 = vpop.eup %435 }
  0xb8   :  { %414 = vmatpush.bf16.msra.mxu3 %v170_v53  ;;  %v438_v58 = vpop.eup %437 }
  0xb9   :  { %v168_v59 = vpack.c.bf16 %v436_v57, %v438_v58 }
  0xbb   :  { %259 = vmatpush.bf16.msrb.mxu1 %v169_v56  ;;  %415 = vmatpush.bf16.msra.mxu2 %v169_v56 }
  0xbc   :  { %416 = vmatpush.bf16.msra.mxu3 %v169_v56 }
  0xbf   :  { %260 = vmatpush.bf16.msrb.mxu1 %v168_v59  ;;  %417 = vmatpush.bf16.msra.mxu2 %v168_v59 }
  0xc0   :  { %418 = vmatpush.bf16.msra.mxu3 %v168_v59 }
  0xc2   :  { %397 = vmatmul.msk.bf16.vlgmr.msrb.gmra.mxu1 %vm240_vm2, %v406_v60  ;;  %398 = vmatmul.msk.bf16.vlgmr.msra.gmra.mxu2 %vm240_vm2, %v407_v61 }
  0xc3   :  { %399 = vmatmul.msk.bf16.vlgmr.msra.gmra.mxu3 %vm240_vm2, %v408_v62 }
  0xd3   :  { %400 = vmatmul.msk.bf16.gmra.mxu3 %vm240_vm2, %v409_v63 }
 0x13f   :  { %v262_v7 = vpop.f32.mrf.mxu1 }
 0x140   :  { %v263_v27 = vadd.f32 %v262_v7, %v183_v24 }
 0x145   :  { %v267_v4 = vpop.f32.mrf.mxu2 }
 0x146   :  { %v272_v0 = vpop.f32.mrf.mxu3  ;;  %v268_v19 = vadd.f32 %v267_v4, %v193_v8 }
 0x147   :  { %v273_v15 = vadd.f32 %v272_v0, %v203_v6  ;;  %v264_v18 = vpop.f32.mrf.mxu1 }
 0x148   :  { %v265_v23 = vadd.f32 %v264_v18, %v188_v21 }
 0x14d   :  { %v269_v14 = vpop.f32.mrf.mxu2 }
 0x14e   :  { %v274_v1 = vpop.f32.mrf.mxu3  ;;  %v270_v17 = vadd.f32 %v269_v14, %v198_v16 }
 0x14f   :  { %v275_v12 = vadd.f32 %v274_v1, %v208_v10 }
 0x156   :  { %v277_v5 = vpop.f32.mrf.mxu3 }
 0x157   :  { %v278_v9 = vadd.f32 %v277_v5, %v213_v3 }
 0x159   :  { %439 = vtanh.f32 %v278_v9 }
 0x15e   :  { %v279_v11 = vpop.f32.mrf.mxu3 }
 0x15f   :  { %v280_v13 = vadd.f32 %v279_v11, %v218_v2  ;;  %v440_v20 = vpop.eup %439 }
 0x161   :  { %441 = vtanh.f32 %v280_v13 }
 0x162   :  { %443 = vtanh.f32 %v275_v12 }
 0x163   :  { %445 = vtanh.f32 %v273_v15 }
 0x164   :  { %447 = vtanh.f32 %v270_v17 }
 0x165   :  { %449 = vtanh.f32 %v268_v19 }
 0x166   :  { %451 = vtanh.f32 %v265_v23 }
 0x167   :  { %v442_v22 = vpop.eup %441  ;;  %453 = vtanh.f32 %v263_v27 }
 0x168   :  { %v294_v25 = vpack.c.bf16 %v442_v22, %v440_v20  ;;  %v444_v26 = vpop.eup %443 }
 0x169   :  { %v446_v28 = vpop.eup %445 }
 0x16a   :  { %308 = vmatpush.bf16.msrb.mxu2 %v294_v25  ;;  %v293_v29 = vpack.c.bf16 %v444_v26, %v446_v28  ;;  %v448_v30 = vpop.eup %447 }
 0x16b   :  { %v450_v31 = vpop.eup %449 }
 0x16c   :  { %v292_v32 = vpack.c.bf16 %v448_v30, %v450_v31  ;;  %v452_v33 = vpop.eup %451 }
 0x16d   :  { %v454_v34 = vpop.eup %453 }
 0x16e   :  { %309 = vmatpush.bf16.msrb.mxu2 %v293_v29  ;;  %v291_v35 = vpack.c.bf16 %v452_v33, %v454_v34 }
 0x172   :  { %310 = vmatpush.bf16.msrb.mxu2 %v292_v32 }
 0x176   :  { %311 = vmatpush.bf16.msrb.mxu2 %v291_v35 }
 0x179   :  { %401 = vmatmul.msk.bf16.vlgmr.msrb.gmra.mxu2 %vm240_vm2, %v290_v36 }
 0x1fc   :  { %v313_v38 = vpop.f32.mrf.mxu2 }
 0x1fd   :  { %v314_v39 = vadd.f32 %v313_v38, %v299_v37 }
 0x1ff   :  { %v317_v40 = vsel %vm119_vm0, %v314_v39, -inf }
 0x200   :  { %v318_v41 = vrot.slane %v317_v40, 4 }
 0x202   :  { %v319_v42 = vmax.f32 %v317_v40, %v318_v41 }
 0x204   :  { %v320_v43 = vrot.slane %v319_v42, 2  ;;  %v315_v44 = vpop.f32.mrf.mxu2 }
 0x206   :  { %v321_v46 = vmax.f32 %v319_v42, %v320_v43 }
 0x208   :  { %v322_v47 = vrot.slane %v321_v46, 1 }
 0x20a   :  { %v323_v49 = vmax.f32 %v321_v46, %v322_v47 }
 0x20c   :  { %v324_v50 = vsub.f32 %v314_v39, %v323_v49  ;;  %vm336_vm3 = vcmp.eq.f32.partialorder %v314_v39, %v323_v49 }
 0x20d   :  { %v337_v51 = vsel %vm336_vm3, %v335_v48, 2 }
 0x20e   :  { %v325_v52 = vmul.f32 1.442695, %v324_v50  ;;  %v338_v53 = vsel %vm119_vm0, %v337_v51, 2147483647 }
 0x20f   :  { %v339_v54 = vrot.slane %v338_v53, 4 }
 0x210   :  { %455 = vpow2.f32 %v325_v52 }
 0x211   :  { %vm340_vm4 = vcmp.lt.s32.totalorder %v338_v53, %v339_v54 }
 0x212   :  { %v341_v55 = vsel %vm340_vm4, %v338_v53, %v339_v54 }
 0x213   :  { %v342_v56 = vrot.slane %v341_v55, 2 }
 0x215   :  { %vm343_vm5 = vcmp.lt.s32.totalorder %v341_v55, %v342_v56 }
 0x216   :  { %v456_v57 = vpop.eup %455  ;;  %v344_v58 = vsel %vm343_vm5, %v341_v55, %v342_v56 }
 0x217   :  { %v327_v59 = vsel %vm119_vm0, %v456_v57, 0.0  ;;  %v345_v60 = vrot.slane %v344_v58, 1 }
 0x218   :  { %v328_v61 = vrot.slane %v327_v59, 4 }
 0x219   :  { %vm346_vm6 = vcmp.lt.s32.totalorder %v344_v58, %v345_v60 }
 0x21a   :  { %v329_v62 = vadd.f32 %v328_v61, %v327_v59  ;;  %v347_v63 = vsel %vm346_vm6, %v344_v58, %v345_v60 }
 0x21b   :  { %351 = vst [vmem:[%s612_s7] sm:$0x1] %v347_v63 }
 0x21c   :  { %v330_v0 = vrot.slane %v329_v62, 2 }
 0x21e   :  { %v331_v1 = vadd.f32 %v330_v0, %v329_v62 }
 0x220   :  { %v332_v2 = vrot.slane %v331_v1, 1 }
 0x222   :  { %v333_v3 = vadd.f32 %v332_v2, %v331_v1 }
 0x224   :  { %457 = vlog2.f32 %v333_v3 }
 0x22a   :  { %v458_v4 = vpop.eup %457 }
 0x22b   :  { %v349_v5 = vmul.f32 0.6931472, %v458_v4 }
 0x22d   :  { %v350_v6 = vsub.f32 0.0, %v349_v5 }
 0x22f   :  { %352 = vst [vmem:[%s613_s8] sm:$0x1] %v350_v6 }

</bundles_post_ra>
